<compile_context>
chip_gen: v7x
topology: tpu7x:2x2x1
jax: 0.10.0
libtpu: 0.0.40
codegen_flags: <defaults>
</compile_context>

<pallas_src>
import jax
import jax.numpy as jnp
from jax.experimental import pallas as pl
from jax.experimental.pallas import tpu as pltpu

LANE = 128   # batch (lane) tiling granularity
FPAD = 32    # feature (sublane) padding: multiple of 8 (f32) and 16 (bf16)


def _round_up(n, m):
    return ((n + m - 1) // m) * m


def _pad_to(a, shape):
    return jnp.pad(a, [(0, s - d) for d, s in zip(a.shape, shape)])


def _make_dcnv2_kernel(cross_layers: int, n_deep: int):
    """Fused kernel: cross net + deep MLP + split output head + sigmoid.

    Activations run transposed (features on sublanes, batch on the 128-wide
    lane axis) so every store is lane-dense and unmasked.
    """

    def kernel(*refs):
        # ref order: x_t, cross_w_t, cross_b_t, (deep_w_t, deep_b)*n_deep,
        #            head_wc, head_wd, out_b, o
        x_ref = refs[0]                        # (D_pad, TB)       bf16
        cw_ref = refs[1]                       # (L, D_pad, D_pad) bf16
        cb_ref = refs[2]                       # (L, D_pad, 1)     f32
        deep_refs = refs[3:3 + 2 * n_deep]
        wc_ref = refs[3 + 2 * n_deep]          # (D_pad, 1)        f32
        wd_ref = refs[4 + 2 * n_deep]          # (H_pad, 1)        f32
        ob_ref = refs[5 + 2 * n_deep]          # (1, 1)            f32
        o_ref = refs[6 + 2 * n_deep]           # (8, TB)           f32

        x_bf = x_ref[...]                      # bf16, batch on lanes
        x = x_bf.astype(jnp.float32)           # f32 for residual / VPU path

        # ---- cross network: cx <- cx + (W^T @ cx + b) ----
        cx = x
        for l in range(cross_layers):
            w_t = cw_ref[l]                    # (D_pad, D_pad) bf16
            b = cb_ref[l]                      # (D_pad, 1) f32
            cx = cx + (jnp.dot(w_t, cx.astype(w_t.dtype),
                               preferred_element_type=jnp.float32) + b)

        # head contribution of the cross branch (lets cx die before deep net)
        logit = jnp.sum(cx * wc_ref[...], axis=0, keepdims=True)   # (1, TB)

        # ---- deep network: relu(W^T @ dx + b) ----
        dx = x
        for i in range(n_deep):
            w_t = deep_refs[2 * i][...]        # (out_pad, in_pad) bf16
            b = deep_refs[2 * i + 1][...]      # (out_pad, 1) f32
            dx = jnp.maximum(
                jnp.dot(w_t, dx.astype(w_t.dtype),
                        preferred_element_type=jnp.float32) + b, 0.0)

        # head contribution of the deep branch + bias, then sigmoid (EUP)
        logit = logit + jnp.sum(dx * wd_ref[...], axis=0, keepdims=True)
        logit = logit + ob_ref[...]            # (1, TB)
        prob = jax.nn.sigmoid(logit)           # (1, TB) f32

        # lane-dense, unmasked stores: replicate across the 8 sublanes
        o_ref[...] = jnp.broadcast_to(prob, o_ref.shape).astype(o_ref.dtype)

    return kernel


def prepare_dcnv2_params(cross_w, cross_b, deep_params, out_w, out_b,
                         *, param_dtype=jnp.bfloat16):
    """One-time layout work: transpose, pad to FPAD, cast. Call-invariant.

    cross_w:     [L, D, D]      (y = x @ W + b convention)
    cross_b:     [L, 1, D]
    deep_params: list of (w_i [in, out], b_i [1, out])
    out_w:       [D + H_last, 1]
    out_b:       [1, 1]
    """
    L, D, _ = cross_w.shape
    H_last = deep_params[-1][0].shape[1]
    D_pad = _round_up(D, FPAD)
    H_pad = _round_up(H_last, FPAD)

    cw_t = _pad_to(jnp.transpose(cross_w, (0, 2, 1)),
                   (L, D_pad, D_pad)).astype(param_dtype)
    cb_t = _pad_to(jnp.transpose(cross_b, (0, 2, 1)),
                   (L, D_pad, 1)).astype(jnp.float32)

    deep_flat = []
    for w, b in deep_params:
        in_p = _round_up(w.shape[0], FPAD)
        out_p = _round_up(w.shape[1], FPAD)
        deep_flat.append(_pad_to(w.T, (out_p, in_p)).astype(param_dtype))
        deep_flat.append(_pad_to(b.T, (out_p, 1)).astype(jnp.float32))

    wc = _pad_to(out_w[:D], (D_pad, 1)).astype(jnp.float32)
    wd = _pad_to(out_w[D:], (H_pad, 1)).astype(jnp.float32)
    ob = out_b.reshape(1, 1).astype(jnp.float32)

    return (cw_t, cb_t, tuple(deep_flat), wc, wd, ob)


def dcnv2_pallas_forward_t(x_t, prepared, *, batch_tile=None,
                           act_dtype=jnp.bfloat16):
    """Fused DCNv2 head on transposed features x_t [D, B] -> [B] probs."""
    cw_t, cb_t, deep_flat, wc, wd, ob = prepared
    L, D_pad, _ = cw_t.shape
    n_deep = len(deep_flat) // 2
    D, B = x_t.shape

    if batch_tile is None:
        # Default: a 2-step "parallel" grid so both v7x TensorCores get work;
        # on single-TC v5e/v6e the extra step costs only ~0.35 us.  Cap the
        # tile so x/output double buffers stay tiny vs. v7x's 64 MiB VMEM.
        batch_tile = min(max(pl.cdiv(B, 2), LANE), 8192)
    bt = min(_round_up(batch_tile, LANE), _round_up(B, LANE))
    B_pad = _round_up(B, bt)
    grid = (B_pad // bt,)

    # only per-call layout work left: small pad (D -> D_pad) + bf16 cast
    x_tp = _pad_to(x_t.astype(act_dtype), (D_pad, B_pad))

    inputs = [x_tp, cw_t, cb_t, *deep_flat, wc, wd, ob]

    def full_spec(arr):
        nd = arr.ndim
        # constant index_map -> DMA'd once, resident across all grid steps
        return pl.BlockSpec(arr.shape, lambda i, _nd=nd: (0,) * _nd)

    in_specs = [pl.BlockSpec((D_pad, bt), lambda i: (0, i))]
    in_specs += [full_spec(a) for a in inputs[1:]]
    out_specs = pl.BlockSpec((8, bt), lambda i: (0, i))

    kernel = _make_dcnv2_kernel(L, n_deep)

    out = pl.pallas_call(
        kernel,
        out_shape=jax.ShapeDtypeStruct((8, B_pad), jnp.float32),
        grid=grid,
        in_specs=in_specs,
        out_specs=out_specs,
        compiler_params=pltpu.CompilerParams(
            dimension_semantics=("parallel",),
            vmem_limit_bytes=32 * 1024 * 1024),
    )(*inputs)

    # Row 0 holds the result; rows 1..7 are sublane replicas for unmasked
    # stores.  Padded batch columns [B:B_pad] hold sigmoid-of-garbage values
    # and MUST be discarded here — do not remove this slice.
    return out[0, :B]


def dcnv2_forward_from_features(prepared, emb_tables, numerical,
                                categorical_emb, categorical_onehot):
    """Full forward: embedding gather + concat glue (kept in JAX because the
    gather is data-dependent), built directly in (features, batch) layout so
    there is no (B, D) -> (D, B) transpose round trip before the kernel."""
    cols = [numerical.T]
    for i, tbl in enumerate(emb_tables):
        cols.append(jnp.take(tbl, categorical_emb[:, i], axis=0).T)
    cols.append(categorical_onehot.T)
    x_t = jnp.concatenate(cols, axis=0)        # (D, B)
    return dcnv2_pallas_forward_t(x_t, prepared)


def dcnv2_reference(x, cross_w, cross_b, deep_params, out_w, out_b):
    """Pure-JAX f32 reference matching the PyTorch forward semantics."""
    cx = x
    for l in range(cross_w.shape[0]):
        cx = cx + (cx @ cross_w[l] + cross_b[l])
    dx = x
    for w, b in deep_params:
        dx = jnp.maximum(dx @ w + b, 0.0)
    comb = jnp.concatenate([cx, dx], axis=1)
    return jax.nn.sigmoid(comb @ out_w + out_b)[:, 0]


if __name__ == "__main__":
    # ---- model config (small dims; batch sized to exercise 2 grid steps) ----
    batch = 512
    num_numerical = 4
    cat_cardinalities = [5, 7, 9]
    embedding_dim = 4
    cross_layers = 2
    deep_layers = [32, 16]
    onehot_size = 6
    n_cats = len(cat_cardinalities)
    input_dim = num_numerical + n_cats * embedding_dim + onehot_size  # 22

    key = jax.random.PRNGKey(0)
    keys = jax.random.split(key, 16)

    # ---- deterministic parameter init ----
    emb_tables = [
        0.1 * jax.random.normal(keys[i], (card + 1, embedding_dim), jnp.float32)
        for i, card in enumerate(cat_cardinalities)
    ]
    cross_w = 0.1 * jax.random.normal(
        keys[4], (cross_layers, input_dim, input_dim), jnp.float32)
    cross_b = 0.1 * jax.random.normal(
        keys[5], (cross_layers, 1, input_dim), jnp.float32)
    deep_dims = [input_dim] + deep_layers
    deep_params = []
    for i in range(len(deep_layers)):
        w = 0.1 * jax.random.normal(
            keys[6 + i], (deep_dims[i], deep_dims[i + 1]), jnp.float32)
        b = 0.1 * jax.random.normal(
            keys[9 + i], (1, deep_dims[i + 1]), jnp.float32)
        deep_params.append((w, b))
    out_w = 0.1 * jax.random.normal(
        keys[12], (input_dim + deep_layers[-1], 1), jnp.float32)
    out_b = 0.1 * jax.random.normal(keys[13], (1, 1), jnp.float32)

    # ---- deterministic inputs ----
    numerical = jax.random.normal(keys[14], (batch, num_numerical), jnp.float32)
    cat_keys = jax.random.split(keys[15], n_cats + 1)
    categorical_emb = jnp.stack(
        [jax.random.randint(cat_keys[i], (batch,), 0, cat_cardinalities[i] + 1)
         for i in range(n_cats)], axis=1)                       # [B, n_cats] int32
    categorical_onehot = (
        jax.random.uniform(cat_keys[-1], (batch, onehot_size)) > 0.5
    ).astype(jnp.float32)

    # ---- one-time weight layout (hoisted out of the per-call path) ----
    prepared = prepare_dcnv2_params(cross_w, cross_b, deep_params, out_w, out_b)
    prepared = jax.tree_util.tree_map(jax.block_until_ready, prepared)

    # ---- run fused forward (glue + Pallas kernel under one jit) ----
    fwd = jax.jit(dcnv2_forward_from_features)
    out = fwd(prepared, emb_tables, numerical, categorical_emb,
              categorical_onehot)
    out = jax.block_until_ready(out)

    # ---- sanity check vs. pure-JAX f32 reference (bf16 operands -> loose tol)
    cat_embeds = jnp.concatenate(
        [jnp.take(emb_tables[i], categorical_emb[:, i], axis=0)
         for i in range(n_cats)], axis=1)
    x = jnp.concatenate([numerical, cat_embeds, categorical_onehot], axis=1)
    assert x.shape == (batch, input_dim)
    ref = dcnv2_reference(x, cross_w, cross_b, deep_params, out_w, out_b)

    assert out.shape == (batch,)
    assert jnp.allclose(out, ref, atol=2e-2, rtol=2e-2), (
        float(jnp.max(jnp.abs(out - ref))))

    print("KERNEL_OK")
</pallas_src>

<mosaic_0001>
module attributes {stable_mosaic.version = 11 : i64} {
  func.func @kernel(%arg0: i32, %arg1: memref<32x256xbf16, #tpu.memory_space<vmem>>, %arg2: memref<2x32x32xbf16, #tpu.memory_space<vmem>>, %arg3: memref<2x32x1xf32, #tpu.memory_space<vmem>>, %arg4: memref<32x32xbf16, #tpu.memory_space<vmem>>, %arg5: memref<32x1xf32, #tpu.memory_space<vmem>>, %arg6: memref<32x32xbf16, #tpu.memory_space<vmem>>, %arg7: memref<32x1xf32, #tpu.memory_space<vmem>>, %arg8: memref<32x1xf32, #tpu.memory_space<vmem>>, %arg9: memref<32x1xf32, #tpu.memory_space<vmem>>, %arg10: memref<1x1xf32, #tpu.memory_space<vmem>>, %arg11: memref<8x256xf32, #tpu.memory_space<vmem>>) attributes {dimension_semantics = [#tpu.dimension_semantics<parallel>], iteration_bounds = array<i64: 2>, scalar_prefetch = 0 : i64, scratch_operands = 0 : i64, tpu.core_type = #tpu.core_type<tc>, window_params = [{transform_indices = @transform_0, window_bounds = array<i64: 32, 256>}, {pipeline_mode = #tpu.pipeline_mode<synchronous>, transform_indices = @transform_1, window_bounds = array<i64: 2, 32, 32>}, {pipeline_mode = #tpu.pipeline_mode<synchronous>, transform_indices = @transform_2, window_bounds = array<i64: 2, 32, 1>}, {pipeline_mode = #tpu.pipeline_mode<synchronous>, transform_indices = @transform_3, window_bounds = array<i64: 32, 32>}, {pipeline_mode = #tpu.pipeline_mode<synchronous>, transform_indices = @transform_4, window_bounds = array<i64: 32, 1>}, {pipeline_mode = #tpu.pipeline_mode<synchronous>, transform_indices = @transform_5, window_bounds = array<i64: 32, 32>}, {pipeline_mode = #tpu.pipeline_mode<synchronous>, transform_indices = @transform_6, window_bounds = array<i64: 32, 1>}, {pipeline_mode = #tpu.pipeline_mode<synchronous>, transform_indices = @transform_7, window_bounds = array<i64: 32, 1>}, {pipeline_mode = #tpu.pipeline_mode<synchronous>, transform_indices = @transform_8, window_bounds = array<i64: 32, 1>}, {pipeline_mode = #tpu.pipeline_mode<synchronous>, transform_indices = @transform_9, window_bounds = array<i64: 1, 1>}, {transform_indices = @transform_10, window_bounds = array<i64: 8, 256>}]} {
    %c0 = arith.constant 0 : index
    %c0_0 = arith.constant 0 : index
    %0 = vector.load %arg1[%c0, %c0_0] : memref<32x256xbf16, #tpu.memory_space<vmem>>, vector<32x256xbf16>
    %1 = arith.extf %0 : vector<32x256xbf16> to vector<32x256xf32>
    %c0_1 = arith.constant 0 : index
    %c0_2 = arith.constant 0 : index
    %c0_3 = arith.constant 0 : index
    %2 = vector.load %arg2[%c0_1, %c0_2, %c0_3] : memref<2x32x32xbf16, #tpu.memory_space<vmem>>, vector<1x32x32xbf16>
    %3 = vector.shape_cast %2 : vector<1x32x32xbf16> to vector<32x32xbf16>
    %c0_4 = arith.constant 0 : index
    %c0_5 = arith.constant 0 : index
    %c0_6 = arith.constant 0 : index
    %4 = vector.load %arg3[%c0_4, %c0_5, %c0_6] : memref<2x32x1xf32, #tpu.memory_space<vmem>>, vector<1x32x1xf32>
    %5 = vector.shape_cast %4 : vector<1x32x1xf32> to vector<32x1xf32>
    %6 = arith.truncf %1 : vector<32x256xf32> to vector<32x256xbf16>
    %cst = arith.constant dense<0.000000e+00> : vector<32x256xf32>
    %7 = tpu.matmul %3, %6, %cst {dimension_numbers = #tpu.dot_dimension_numbers<[1], [0], [0], [1], [0, 0, 1, 1], [], []>} : vector<32x32xbf16>, vector<32x256xbf16>, vector<32x256xf32> -> vector<32x256xf32>
    %8 = vector.broadcast %5 : vector<32x1xf32> to vector<32x256xf32>
    %9 = arith.addf %7, %8 : vector<32x256xf32>
    %10 = arith.addf %1, %9 : vector<32x256xf32>
    %c1 = arith.constant 1 : index
    %c0_7 = arith.constant 0 : index
    %c0_8 = arith.constant 0 : index
    %11 = vector.load %arg2[%c1, %c0_7, %c0_8] : memref<2x32x32xbf16, #tpu.memory_space<vmem>>, vector<1x32x32xbf16>
    %12 = vector.shape_cast %11 : vector<1x32x32xbf16> to vector<32x32xbf16>
    %c1_9 = arith.constant 1 : index
    %c0_10 = arith.constant 0 : index
    %c0_11 = arith.constant 0 : index
    %13 = vector.load %arg3[%c1_9, %c0_10, %c0_11] : memref<2x32x1xf32, #tpu.memory_space<vmem>>, vector<1x32x1xf32>
    %14 = vector.shape_cast %13 : vector<1x32x1xf32> to vector<32x1xf32>
    %15 = arith.truncf %10 : vector<32x256xf32> to vector<32x256xbf16>
    %cst_12 = arith.constant dense<0.000000e+00> : vector<32x256xf32>
    %16 = tpu.matmul %12, %15, %cst_12 {dimension_numbers = #tpu.dot_dimension_numbers<[1], [0], [0], [1], [0, 0, 1, 1], [], []>} : vector<32x32xbf16>, vector<32x256xbf16>, vector<32x256xf32> -> vector<32x256xf32>
    %17 = vector.broadcast %14 : vector<32x1xf32> to vector<32x256xf32>
    %18 = arith.addf %16, %17 : vector<32x256xf32>
    %19 = arith.addf %10, %18 : vector<32x256xf32>
    %c0_13 = arith.constant 0 : index
    %c0_14 = arith.constant 0 : index
    %20 = vector.load %arg8[%c0_13, %c0_14] : memref<32x1xf32, #tpu.memory_space<vmem>>, vector<32x1xf32>
    %21 = vector.broadcast %20 : vector<32x1xf32> to vector<32x256xf32>
    %22 = arith.mulf %19, %21 : vector<32x256xf32>
    %cst_15 = arith.constant dense<0.000000e+00> : vector<256xf32>
    %23 = vector.multi_reduction <add>, %22, %cst_15 [0] : vector<32x256xf32> to vector<256xf32>
    %24 = vector.shape_cast %23 : vector<256xf32> to vector<1x256xf32>
    %c0_16 = arith.constant 0 : index
    %c0_17 = arith.constant 0 : index
    %25 = vector.load %arg4[%c0_16, %c0_17] : memref<32x32xbf16, #tpu.memory_space<vmem>>, vector<32x32xbf16>
    %c0_18 = arith.constant 0 : index
    %c0_19 = arith.constant 0 : index
    %26 = vector.load %arg5[%c0_18, %c0_19] : memref<32x1xf32, #tpu.memory_space<vmem>>, vector<32x1xf32>
    %27 = arith.truncf %1 : vector<32x256xf32> to vector<32x256xbf16>
    %cst_20 = arith.constant dense<0.000000e+00> : vector<32x256xf32>
    %28 = tpu.matmul %25, %27, %cst_20 {dimension_numbers = #tpu.dot_dimension_numbers<[1], [0], [0], [1], [0, 0, 1, 1], [], []>} : vector<32x32xbf16>, vector<32x256xbf16>, vector<32x256xf32> -> vector<32x256xf32>
    %29 = vector.broadcast %26 : vector<32x1xf32> to vector<32x256xf32>
    %30 = arith.addf %28, %29 : vector<32x256xf32>
    %cst_21 = arith.constant 0.000000e+00 : f32
    %31 = vector.broadcast %cst_21 : f32 to vector<32x256xf32>
    %32 = arith.maximumf %30, %31 : vector<32x256xf32>
    %c0_22 = arith.constant 0 : index
    %c0_23 = arith.constant 0 : index
    %33 = vector.load %arg6[%c0_22, %c0_23] : memref<32x32xbf16, #tpu.memory_space<vmem>>, vector<32x32xbf16>
    %c0_24 = arith.constant 0 : index
    %c0_25 = arith.constant 0 : index
    %34 = vector.load %arg7[%c0_24, %c0_25] : memref<32x1xf32, #tpu.memory_space<vmem>>, vector<32x1xf32>
    %35 = arith.truncf %32 : vector<32x256xf32> to vector<32x256xbf16>
    %cst_26 = arith.constant dense<0.000000e+00> : vector<32x256xf32>
    %36 = tpu.matmul %33, %35, %cst_26 {dimension_numbers = #tpu.dot_dimension_numbers<[1], [0], [0], [1], [0, 0, 1, 1], [], []>} : vector<32x32xbf16>, vector<32x256xbf16>, vector<32x256xf32> -> vector<32x256xf32>
    %37 = vector.broadcast %34 : vector<32x1xf32> to vector<32x256xf32>
    %38 = arith.addf %36, %37 : vector<32x256xf32>
    %cst_27 = arith.constant 0.000000e+00 : f32
    %39 = vector.broadcast %cst_27 : f32 to vector<32x256xf32>
    %40 = arith.maximumf %38, %39 : vector<32x256xf32>
    %c0_28 = arith.constant 0 : index
    %c0_29 = arith.constant 0 : index
    %41 = vector.load %arg9[%c0_28, %c0_29] : memref<32x1xf32, #tpu.memory_space<vmem>>, vector<32x1xf32>
    %42 = vector.broadcast %41 : vector<32x1xf32> to vector<32x256xf32>
    %43 = arith.mulf %40, %42 : vector<32x256xf32>
    %cst_30 = arith.constant dense<0.000000e+00> : vector<256xf32>
    %44 = vector.multi_reduction <add>, %43, %cst_30 [0] : vector<32x256xf32> to vector<256xf32>
    %45 = vector.shape_cast %44 : vector<256xf32> to vector<1x256xf32>
    %46 = arith.addf %24, %45 : vector<1x256xf32>
    %c0_31 = arith.constant 0 : index
    %c0_32 = arith.constant 0 : index
    %47 = vector.load %arg10[%c0_31, %c0_32] : memref<1x1xf32, #tpu.memory_space<vmem>>, vector<1x1xf32>
    %48 = vector.broadcast %47 : vector<1x1xf32> to vector<1x256xf32>
    %49 = arith.addf %46, %48 : vector<1x256xf32>
    %50 = arith.negf %49 : vector<1x256xf32>
    %51 = math.exp %50 : vector<1x256xf32>
    %cst_33 = arith.constant 1.000000e+00 : f32
    %52 = vector.broadcast %cst_33 : f32 to vector<1x256xf32>
    %53 = arith.addf %52, %51 : vector<1x256xf32>
    %54 = arith.divf %52, %53 : vector<1x256xf32>
    %55 = vector.shape_cast %54 : vector<1x256xf32> to vector<1x256xf32>
    %56 = vector.broadcast %55 : vector<1x256xf32> to vector<8x256xf32>
    %c0_34 = arith.constant 0 : index
    %c0_35 = arith.constant 0 : index
    %57 = vector.load %arg11[%c0_34, %c0_35] : memref<8x256xf32, #tpu.memory_space<vmem>>, vector<8x256xf32>
    tpu.vector_store %arg11[%c0_34, %c0_35], %56 {strides = array<i32>} : memref<8x256xf32, #tpu.memory_space<vmem>>, vector<8x256xf32>,
    return
  }
  func.func @transform_0(%arg0: i32) -> (i32, i32) {
    %c0_i32 = arith.constant 0 : i32
    %c0_i32_0 = arith.constant 0 : i32
    return %c0_i32, %arg0 : i32, i32
  }
  func.func @transform_1(%arg0: i32) -> (i32, i32, i32) {
    %c0_i32 = arith.constant 0 : i32
    %c0_i32_0 = arith.constant 0 : i32
    %c0_i32_1 = arith.constant 0 : i32
    %c0_i32_2 = arith.constant 0 : i32
    return %c0_i32, %c0_i32_0, %c0_i32_1 : i32, i32, i32
  }
  func.func @transform_2(%arg0: i32) -> (i32, i32, i32) {
    %c0_i32 = arith.constant 0 : i32
    %c0_i32_0 = arith.constant 0 : i32
    %c0_i32_1 = arith.constant 0 : i32
    %c0_i32_2 = arith.constant 0 : i32
    return %c0_i32, %c0_i32_0, %c0_i32_1 : i32, i32, i32
  }
  func.func @transform_3(%arg0: i32) -> (i32, i32) {
    %c0_i32 = arith.constant 0 : i32
    %c0_i32_0 = arith.constant 0 : i32
    %c0_i32_1 = arith.constant 0 : i32
    return %c0_i32, %c0_i32_0 : i32, i32
  }
  func.func @transform_4(%arg0: i32) -> (i32, i32) {
    %c0_i32 = arith.constant 0 : i32
    %c0_i32_0 = arith.constant 0 : i32
    %c0_i32_1 = arith.constant 0 : i32
    return %c0_i32, %c0_i32_0 : i32, i32
  }
  func.func @transform_5(%arg0: i32) -> (i32, i32) {
    %c0_i32 = arith.constant 0 : i32
    %c0_i32_0 = arith.constant 0 : i32
    %c0_i32_1 = arith.constant 0 : i32
    return %c0_i32, %c0_i32_0 : i32, i32
  }
  func.func @transform_6(%arg0: i32) -> (i32, i32) {
    %c0_i32 = arith.constant 0 : i32
    %c0_i32_0 = arith.constant 0 : i32
    %c0_i32_1 = arith.constant 0 : i32
    return %c0_i32, %c0_i32_0 : i32, i32
  }
  func.func @transform_7(%arg0: i32) -> (i32, i32) {
    %c0_i32 = arith.constant 0 : i32
    %c0_i32_0 = arith.constant 0 : i32
    %c0_i32_1 = arith.constant 0 : i32
    return %c0_i32, %c0_i32_0 : i32, i32
  }
  func.func @transform_8(%arg0: i32) -> (i32, i32) {
    %c0_i32 = arith.constant 0 : i32
    %c0_i32_0 = arith.constant 0 : i32
    %c0_i32_1 = arith.constant 0 : i32
    return %c0_i32, %c0_i32_0 : i32, i32
  }
  func.func @transform_9(%arg0: i32) -> (i32, i32) {
    %c0_i32 = arith.constant 0 : i32
    %c0_i32_0 = arith.constant 0 : i32
    %c0_i32_1 = arith.constant 0 : i32
    return %c0_i32, %c0_i32_0 : i32, i32
  }
  func.func @transform_10(%arg0: i32) -> (i32, i32) {
    %c0_i32 = arith.constant 0 : i32
    %c0_i32_0 = arith.constant 0 : i32
    return %c0_i32, %arg0 : i32, i32
  }
}

</mosaic_0001>

<bundles_post_ra>
// kernel: dcnv2_forward_from_features.1
= control target key start
LH: loop header
LB: loop body
LE: loop exit
PB: predicated region body
PF: predicated region fallthrough
CT: control target
= control target key end

     0   :  { %s1465_s0 = inlined_call_operand.vmem [shape: bf16[32,512], index: 0, kind: input, shape index: {}]   ;;  %s1466_s1 = inlined_call_operand.vmem [shape: bf16[2,32,32], index: 1, kind: input, shape index: {}]   ;;  %s1467_s2 = inlined_call_operand.vmem [shape: f32[2,32,1], index: 2, kind: input, shape index: {}]   ;;  %s1468_s3 = inlined_call_operand.vmem [shape: bf16[32,32], index: 3, kind: input, shape index: {}]   ;;  %s1469_s4 = inlined_call_operand.vmem [shape: f32[32,1], index: 4, kind: input, shape index: {}]   ;;  %s1470_s5 = inlined_call_operand.vmem [shape: bf16[32,32], index: 5, kind: input, shape index: {}]   ;;  %s1471_s6 = inlined_call_operand.vmem [shape: f32[32,1], index: 6, kind: input, shape index: {}]   ;;  %s1472_s7 = inlined_call_operand.vmem [shape: f32[32,1], index: 7, kind: input, shape index: {}]   ;;  %s1473_s8 = inlined_call_operand.vmem [shape: f32[32,1], index: 8, kind: input, shape index: {}]   ;;  %s1474_s9 = inlined_call_operand.<no memory space> [shape: f32[1,1], index: 9, kind: input, shape index: {}]   ;;  %s1475_s10 = inlined_call_operand.vmem [shape: f32[8,512], index: 10, kind: output, shape index: {}]  }
   0x1   :  { %v15_v0 = vstv %s1474_s9 }
   0x2   :  { %16 = vst [vmem:[#allocation2] sm:$0x1] %v15_v0 }
   0x3   :  { %s1239_s15 = smov 0   ;;  %s1241_s16 = smov 0  }
   0x4   :  { %s1243_s17 = smov 0  }
   0x5 LB: > { %s1065_s9 = sadd.s32 4294967295, %s1178_s17   ;;  %s1256_s18 = sadd.s32 1, %s1178_s17   ;;  %s1178_s17 = sphi %s1243_s17, %s1478_s17   ;;  %s1174_s16 = sphi %s1241_s16, %s1477_s16   ;;  %s1170_s15 = sphi %s1239_s15, %s1476_s15  }
   0x6   : > { %s26_s19 = ssub.s32 %s1178_s17, %s1256_s18  ;;  %s29_s20 = sadd.s32 1, %s1174_s16 }
   0x7   : > { %p27_p0 = scmp.eq.s32.totalorder %s26_s19, 0  ;;  %p36_p1 = scmp.ne.s32.totalorder %s1174_s16, %s1170_s15 }
   0x8   : > { %p37_p2 = scmp.eq.s32.totalorder %s1178_s17, 0  ;;  %p1068_p4 = scmp.ge.s32.totalorder %s1178_s17, 2 }
   0x9   : > { %s1265_s21 = scalar_select %p27_p0, %s1174_s16, %s29_s20  }
   0xa   : > { %p38_p3 = por %p37_p2, %p36_p1  ;;  %304 = sbr.rel (%p1068_p4) target bundleno = 24 (0x18), region = 52 }
  0x11   : > { %307 = sbr.rel (!%p38_p3) target bundleno = 24 (0x18), region = 56  ;;  %s309_s22 = sand.u32 (%p38_p3), 1, %s1174_s16  }
  0x12   : > { %s1108_s23 = sshll.u32 (%p38_p3), %s1178_s17, 3  ;;  %s1069_s24 = sshll.u32 (%p38_p3), %s309_s22, 5 }
  0x13   : > { %s314_s27 = scalar_lea.vmem (%p38_p3), %s1465_s0, %s1108_s23  ;;  %s311_s28 = scalar_lea.vmem (%p38_p3), [#allocation3], %s1069_s24 }
  0x14   : > { %v348_v1 = vld [vmem:[%s314_s27] sm:$0xff] (%p38_p3)  ;;  %v350_v2 = vld [vmem:[%s314_s27 + $0x10] sm:$0xff] (%p38_p3) }
  0x15   : > { %v352_v3 = vld [vmem:[%s314_s27 + $0x20] sm:$0xff] (%p38_p3)  ;;  %349 = vst [vmem:[%s311_s28] sm:$0xff] (%p38_p3), %v348_v1  ;;  %351 = vst [vmem:[%s311_s28 + $0x8] sm:$0xff] (%p38_p3), %v350_v2  ;;  %v354_v4 = vld [vmem:[%s314_s27 + $0x30] sm:$0xff] (%p38_p3) }
  0x16   : > { %353 = vst [vmem:[%s311_s28 + $0x10] sm:$0xff] (%p38_p3), %v352_v3  ;;  %355 = vst [vmem:[%s311_s28 + $0x18] sm:$0xff] (%p38_p3), %v354_v4 }
  0x18 PF: > { %p1072_p5 = scmp.ge.s32.totalorder %s1178_s17, 1  ;;  %p360_p6 = scmp.lt.s32.totalorder %s1178_s17, 3 }
  0x1a   : > { %p361_p7 = pnand %p1072_p5, %p360_p6 }
  0x1b   : > { %s367_s29 = sand.u32 (!%p361_p7), 1, %s1170_s15   ;;  %v1180_v5 = vmov (!%p361_p7), 0   ;;  %v428_v13 = vld [vmem:[%s1467_s2] sm:$0xff] (!%p361_p7)  ;;  %v430_v14 = vld [vmem:[%s1467_s2 + $0x10] sm:$0xff] (!%p361_p7)  ;;  %v429_v16 = vld [vmem:[%s1467_s2 + $0x8] sm:$0xff] (!%p361_p7)  ;;  %vm482_vm0 = vcmask (!%p361_p7), 261120  }
  0x1c   : > { %364 = sbr.rel (%p361_p7) target bundleno = 564 (0x234), region = 94  ;;  %s1073_s30 = sshll.u32 (!%p361_p7), %s367_s29, 5  ;;  %521 = vmatprep.mubr.bf16.mxu0 (!%p361_p7), %v1180_v5  ;;  %1134 = vset.pattern.permute.xlu0 (!%p361_p7), %v1180_v5  ;;  %v431_v17 = vld [vmem:[%s1467_s2 + $0x18] sm:$0xff] (!%p361_p7)  ;;  %v1140_v18 = vld [vmem:[%s1466_s1] sm:$0xff] (!%p361_p7)   ;;  %v717_v20 = vld [vmem:[%s1469_s4 + $0x10] sm:$0xff] (!%p361_p7) }
  0x1d   : > { %1135 = vset.pattern.permute.xlu1 (!%p361_p7), %v1180_v5  ;;  %632 = vmatprep.mubr.bf16.mxu1 (!%p361_p7), %v1180_v5  ;;  %s369_s11 = scalar_lea.vmem (!%p361_p7), [#allocation3], %s1073_s30  ;;  %v715_v19 = vld [vmem:[%s1469_s4] sm:$0xff] (!%p361_p7)  ;;  %v716_v21 = vld [vmem:[%s1469_s4 + $0x8] sm:$0xff] (!%p361_p7)  ;;  %v718_v22 = vld [vmem:[%s1469_s4 + $0x18] sm:$0xff] (!%p361_p7)  ;;  %s1074_s12 = sshll.u32 (!%p361_p7), %s1065_s9, 1 }
  0x1e   : > { %v1280_v6 = vld [vmem:[%s369_s11] sm:$0xff] (!%p361_p7)  ;;  %v1282_v7 = vld [vmem:[%s369_s11 + $0x8] sm:$0xff] (!%p361_p7)  ;;  %v1284_v8 = vld [vmem:[%s369_s11 + $0x10] sm:$0xff] (!%p361_p7)  ;;  %434 = vperm.xlu0 (!%p361_p7), %1134, %v428_v13   ;;  %444 = vperm.xlu1 (!%p361_p7), %1135, %v430_v14   ;;  %p406_p8 = scmp.lt.s32.totalorder (!%p361_p7), %s1074_s12, 3 }
  0x1f   : > { %v1079_v9 = vcombine.high (!%p361_p7), %v1280_v6, %v1282_v7  ;;  %v1078_v10 = vcombine.low (!%p361_p7), %v1280_v6, %v1282_v7  ;;  %v1290_v11 = vld [vmem:[%s369_s11 + $0x18] sm:$0xff] (!%p361_p7)  ;;  %v1141_v23 = vld [vmem:[%s1466_s1 + $0x8] sm:$0xff] (!%p361_p7)   ;;  %v1090_v29 = vld [vmem:[%s1467_s2 + $0x30] sm:$0xff] (!%p361_p7)  ;;  %v418_v46 = vunpack.c.l.bf16 (!%p361_p7), %v1282_v7  ;;  %v417_v50 = vunpack.c.h.bf16 (!%p361_p7), %v1280_v6 }
  0x20   : > { %v1081_v12 = vcombine.high (!%p361_p7), %v1284_v8, %v1290_v11  ;;  %v1080_v15 = vcombine.low (!%p361_p7), %v1284_v8, %v1290_v11  ;;  %v1088_v24 = vld [vmem:[%s1467_s2 + $0x20] sm:$0xff] (!%p361_p7)  ;;  %v1089_v25 = vld [vmem:[%s1467_s2 + $0x28] sm:$0xff] (!%p361_p7)  ;;  %v822_v30 = vld [vmem:[%s1471_s6 + $0x10] sm:$0xff] (!%p361_p7)  ;;  %v419_v51 = vunpack.c.h.bf16 (!%p361_p7), %v1282_v7  ;;  %v416_v52 = vunpack.c.l.bf16 (!%p361_p7), %v1280_v6 }
  0x21   : > { %489 = vmatprep.subr.bf16.mxu0 (!%p361_p7), %v1079_v9  ;;  %v820_v26 = vld [vmem:[%s1471_s6] sm:$0xff] (!%p361_p7)  ;;  %v821_v27 = vld [vmem:[%s1471_s6 + $0x8] sm:$0xff] (!%p361_p7)  ;;  %v1091_v31 = vld [vmem:[%s1467_s2 + $0x38] sm:$0xff] (!%p361_p7)  ;;  %v422_v1 = vunpack.c.l.bf16 (!%p361_p7), %v1290_v11  ;;  %v421_v4 = vunpack.c.h.bf16 (!%p361_p7), %v1284_v8 }
  0x22   : > { %490 = vmatpush1.bf16.msra.mxu0 (!%p361_p7), %v1078_v10  ;;  %439 = vperm.xlu0 (!%p361_p7), %1134, %v429_v16   ;;  %v1142_v28 = vld [vmem:[%s1468_s3] sm:$0xff] (!%p361_p7)   ;;  %v1143_v33 = vld [vmem:[%s1468_s3 + $0x8] sm:$0xff] (!%p361_p7)   ;;  %v823_v35 = vld [vmem:[%s1471_s6 + $0x18] sm:$0xff] (!%p361_p7) }
  0x23   : > { %491 = vmatprep.subr.bf16.mxu0 %v1081_v12  ;;  %449 = vperm.xlu1 %1135, %v431_v17   ;;  %v661_v32 = vld [vmem:[%s1472_s7] sm:$0xff]  ;;  %v662_v34 = vld [vmem:[%s1472_s7 + $0x8] sm:$0xff]  ;;  %v663_v38 = vld [vmem:[%s1472_s7 + $0x10] sm:$0xff]  ;;  %s1480_s12 = smov (!%p406_p8, %s1074_s12), 3 }
  0x24   : > { %v925_v36 = vld [vmem:[%s1473_s8] sm:$0xff]  ;;  %v926_v37 = vld [vmem:[%s1473_s8 + $0x8] sm:$0xff]  ;;  %v927_v39 = vld [vmem:[%s1473_s8 + $0x10] sm:$0xff]  ;;  %s1075_s13 = sshll.u32 %s1480_s12, 3 }
  0x25   : > { %v664_v40 = vld [vmem:[%s1472_s7 + $0x18] sm:$0xff]  ;;  %v977_v42 = vld [vmem:[#allocation2] sm:$0x1]  ;;  %s409_s19 = scalar_lea.vmem %s1475_s10, %s1075_s13 }
  0x26   : > { %492 = vmatpush1.bf16.msra.mxu0 %v1080_v15  ;;  %721 = vperm.xlu0 %1134, %v715_v19   ;;  %v928_v41 = vld [vmem:[%s1473_s8 + $0x18] sm:$0xff] }
  0x27   : > { %755 = vmatprep.subr.bf16.mxu0 %v1079_v9  ;;  %726 = vperm.xlu1 %1135, %v716_v21   ;;  %v423_v9 = vunpack.c.h.bf16 %v1290_v11 }
  0x29   : > { %1082 = vmatmul.mubr.msk.bf16.vlgmr.msra.gmra.mrb[0].mxu0 %vm482_vm0, %v1140_v18 }
  0x2a   : > { %756 = vmatpush1.bf16.msra.mxu0 %v1078_v10  ;;  %531 = vmatprep.mubr.bf16.mxu0 %v1180_v5  ;;  %v420_v10 = vunpack.c.l.bf16 %v1284_v8 }
  0x2b   : > { %757 = vmatprep.subr.bf16.mxu0 %v1081_v12  ;;  %731 = vperm.xlu0 %1134, %v717_v20  }
  0x2c   : > { %736 = vperm.xlu1 %1135, %v718_v22  }
  0x2e   : > { %758 = vmatpush1.bf16.msra.mxu0 %v1080_v15 }
  0x2f   : > { %566 = vperm.xlu0 %1134, %v1088_v24  }
  0x30   : > { %571 = vperm.xlu1 %1135, %v1089_v25  }
  0x31   : > { %1083 = vmatmul.mubr.msk.bf16.gmra.mrb[4].mxu0 %vm482_vm0, %v1141_v23 }
  0x32   : > { %787 = vmatprep.mubr.bf16.mxu0 %v1180_v5 }
  0x33   : > { %830 = vperm.xlu0 %1134, %v820_v26  }
  0x34   : > { %835 = vperm.xlu1 %1135, %v821_v27   ;;  %v1144_v27 = vld [vmem:[%s1466_s1 + $0x10] sm:$0xff]  }
  0x37   : > { %576 = vperm.xlu0 %1134, %v1090_v29  }
  0x38   : > { %840 = vperm.xlu1 %1135, %v822_v30  }
  0x39   : > { %1098 = vmatmul.mubr.msk.bf16.vlgmr.msra.gmra.mrb[8].mxu0 %vm482_vm0, %v1142_v28 }
  0x3a   : > { %797 = vmatprep.mubr.bf16.mxu0 %v1180_v5 }
  0x3b   : > { %581 = vperm.xlu0 %1134, %v1091_v31  }
  0x3c   : > { %667 = vperm.xlu1 %1135, %v661_v32  }
  0x3f   : > { %672 = vperm.xlu0 %1134, %v662_v34  }
  0x40   : > { %845 = vperm.xlu1 %1135, %v823_v35  }
  0x41   : > { %1099 = vmatmul.mubr.msk.bf16.gmra.mrb[12].mxu0 %vm482_vm0, %v1143_v33 }
  0x43   : > { %931 = vperm.xlu0 %1134, %v925_v36  }
  0x44   : > { %936 = vperm.xlu1 %1135, %v926_v37  }
  0x47   : > { %677 = vperm.xlu0 %1134, %v663_v38  }
  0x48   : > { %941 = vperm.xlu1 %1135, %v927_v39  }
  0x4b   : > { %682 = vperm.xlu0 %1134, %v664_v40  }
  0x4c   : > { %946 = vperm.xlu1 %1135, %v928_v41  }
  0x4f   : > { %980 = vperm.xlu0 %1134, %v977_v42  }
  0x9d   : > { %v435_v43 = vpop.permute.xlu0 %434  ;;  %v445_v56 = vpop.permute.xlu1 %444 }
  0xa1   : > { %v440_v47 = vpop.permute.xlu0 %439 }
  0xa2   : > { %v450_v3 = vpop.permute.xlu1 %449 }
  0xa5   : > { %v722_v20 = vpop.permute.xlu0 %721 }
  0xa6   : > { %v727_v24 = vpop.permute.xlu1 %726 }
  0xaa   : > { %v732_v36 = vpop.permute.xlu0 %731 }
  0xab   : > { %v737_v41 = vpop.permute.xlu1 %736 }
  0xfc   : > { %v523_v44 = vpop.f32.mrb[0].mxu0 }
  0xfd   : > { %v525_v45 = vpop.f32.mrb[1].mxu0  ;;  %v524_v53 = vadd.f32 %v523_v44, %v435_v43  ;;  %v1145_v44 = vld [vmem:[%s1466_s1 + $0x18] sm:$0xff]  }
  0xfe   : > { %v526_v48 = vadd.f32 %v525_v45, %v435_v43  ;;  %v527_v49 = vpop.f32.mrb[2].mxu0 }
  0xff   : > { %v528_v54 = vadd.f32 %v527_v49, %v440_v47  ;;  %v529_v55 = vpop.f32.mrb[3].mxu0  ;;  %v1397_v61 = vadd.f32 %v524_v53, %v416_v52 }
 0x100   : > { %v530_v57 = vadd.f32 %v529_v55, %v440_v47  ;;  %v1393_v59 = vadd.f32 %v526_v48, %v417_v50  ;;  %v1147_v55 = vld [vmem:[%s1470_s5 + $0x8] sm:$0xff]  }
 0x101   : > { %v1391_v58 = vadd.f32 %v528_v54, %v418_v46  ;;  %v1146_v54 = vld [vmem:[%s1470_s5] sm:$0xff]  }
 0x102   : > { %v1395_v60 = vadd.f32 %v530_v57, %v419_v51 }
 0x103   : > { %v560_v2 = vpack.c.bf16 %v1391_v58, %v1397_v61 }
 0x104   : > { %v533_v62 = vpop.f32.mrb[4].mxu0  ;;  %v561_v63 = vpack.c.bf16 %v1395_v60, %v1393_v59 }
 0x105   : > { %v535_v0 = vpop.f32.mrb[5].mxu0  ;;  %v534_v12 = vadd.f32 %v533_v62, %v445_v56 }
 0x106   : > { %v536_v6 = vadd.f32 %v535_v0, %v445_v56  ;;  %v537_v7 = vpop.f32.mrb[6].mxu0  ;;  %600 = vmatprep.subr.bf16.mxu1 %v561_v63  ;;  %v567_v56 = vpop.permute.xlu0 %566 }
 0x107   : > { %v538_v13 = vadd.f32 %v537_v7, %v450_v3  ;;  %v539_v14 = vpop.f32.mrb[7].mxu0  ;;  %601 = vmatpush1.bf16.msra.mxu1 %v560_v2  ;;  %v1413_v19 = vadd.f32 %v534_v12, %v420_v10  ;;  %v572_v63 = vpop.permute.xlu1 %571 }
 0x108   : > { %v540_v15 = vadd.f32 %v539_v14, %v450_v3  ;;  %v1409_v17 = vadd.f32 %v536_v6, %v421_v4 }
 0x109   : > { %v1407_v16 = vadd.f32 %v538_v13, %v422_v1 }
 0x10a   : > { %v1411_v18 = vadd.f32 %v540_v15, %v423_v9  ;;  %v831_v57 = vpop.permute.xlu0 %830 }
 0x10b   : > { %v562_v23 = vpack.c.bf16 %v1407_v16, %v1413_v19  ;;  %v836_v1 = vpop.permute.xlu1 %835 }
 0x10c   : > { %v789_v21 = vpop.f32.mrb[8].mxu0  ;;  %v563_v11 = vpack.c.bf16 %v1411_v18, %v1409_v17 }
 0x10d   : > { %v790_v22 = vadd.f32 %v789_v21, %v722_v20  ;;  %v791_v8 = vpop.f32.mrb[9].mxu0 }
 0x10e   : > { %v792_v25 = vadd.f32 %v791_v8, %v722_v20  ;;  %602 = vmatprep.subr.bf16.mxu1 %v563_v11  ;;  %v793_v26 = vpop.f32.mrb[10].mxu0  ;;  %v577_v62 = vpop.permute.xlu0 %576 }
 0x10f   : > { %v794_v28 = vadd.f32 %v793_v26, %v727_v24  ;;  %603 = vmatpush1.bf16.msra.mxu1 %v562_v23  ;;  %v795_v29 = vpop.f32.mrb[11].mxu0  ;;  %v808_v31 = vmax.f32 %v790_v22, 0.0  ;;  %v1438_v3 = vpop.permute.xlu1 %840 }
 0x110   : > { %v796_v30 = vadd.f32 %v795_v29, %v727_v24  ;;  %v809_v33 = vmax.f32 %v792_v25, 0.0 }
 0x111   : > { %v810_v32 = vmax.f32 %v794_v28, 0.0 }
 0x112   : > { %v811_v34 = vmax.f32 %v796_v30, 0.0  ;;  %1094 = vmatmul.mubr.msk.bf16.vlgmr.msra.gmra.mrb[0].mxu1 %vm482_vm0, %v1144_v27  ;;  %v582_v0 = vpop.permute.xlu0 %581 }
 0x113   : > { %v824_v35 = vpack.c.bf16 %v810_v32, %v808_v31  ;;  %642 = vmatprep.mubr.bf16.mxu1 %v1180_v5  ;;  %v668_v11 = vpop.permute.xlu1 %667 }
 0x114   : > { %v825_v37 = vpack.c.bf16 %v811_v34, %v809_v33  ;;  %v799_v38 = vpop.f32.mrb[12].mxu0 }
 0x115   : > { %v800_v39 = vadd.f32 %v799_v38, %v732_v36  ;;  %v801_v40 = vpop.f32.mrb[13].mxu0 }
 0x116   : > { %v802_v42 = vadd.f32 %v801_v40, %v732_v36  ;;  %v803_v43 = vpop.f32.mrb[14].mxu0  ;;  %864 = vmatprep.subr.bf16.mxu1 %v825_v37  ;;  %v673_v2 = vpop.permute.xlu0 %672 }
 0x117   : > { %v804_v45 = vadd.f32 %v803_v43, %v737_v41  ;;  %v805_v46 = vpop.f32.mrb[15].mxu0  ;;  %865 = vmatpush1.bf16.msra.mxu1 %v824_v35  ;;  %v812_v48 = vmax.f32 %v800_v39, 0.0 }
 0x118   : > { %v806_v47 = vadd.f32 %v805_v46, %v737_v41  ;;  %v813_v50 = vmax.f32 %v802_v42, 0.0 }
 0x119   : > { %v814_v49 = vmax.f32 %v804_v45, 0.0 }
 0x11a   : > { %v815_v51 = vmax.f32 %v806_v47, 0.0  ;;  %1095 = vmatmul.mubr.msk.bf16.gmra.mrb[4].mxu1 %vm482_vm0, %v1145_v44  ;;  %v932_v9 = vpop.permute.xlu0 %931 }
 0x11b   : > { %v826_v52 = vpack.c.bf16 %v814_v49, %v812_v48  ;;  %896 = vmatprep.mubr.bf16.mxu1 %v1180_v5 }
 0x11c   : > { %v827_v53 = vpack.c.bf16 %v815_v51, %v813_v50 }
 0x11e   : > { %866 = vmatprep.subr.bf16.mxu1 %v827_v53  ;;  %v678_v24 = vpop.permute.xlu0 %677 }
 0x11f   : > { %867 = vmatpush1.bf16.msra.mxu1 %v826_v52 }
 0x122   : > { %1102 = vmatmul.mubr.msk.bf16.vlgmr.msra.gmra.mrb[8].mxu1 %vm482_vm0, %v1146_v54  ;;  %v683_v38 = vpop.permute.xlu0 %682 }
 0x123   : > { %906 = vmatprep.mubr.bf16.mxu1 %v1180_v5 }
 0x12a   : > { %1103 = vmatmul.mubr.msk.bf16.gmra.mrb[12].mxu1 %vm482_vm0, %v1147_v55 }
 0x1e5   : > { %v634_v4 = vpop.f32.mrb[0].mxu1 }
 0x1e6   : > { %v635_v6 = vadd.f32 %v634_v4, %v567_v56  ;;  %v636_v7 = vpop.f32.mrb[1].mxu1 }
 0x1e7   : > { %v637_v5 = vadd.f32 %v636_v7, %v567_v56  ;;  %v638_v10 = vpop.f32.mrb[2].mxu1 }
 0x1e8   : > { %v653_v12 = vadd.f32 %v635_v6, %v1397_v61  ;;  %v639_v13 = vadd.f32 %v638_v10, %v572_v63  ;;  %v640_v14 = vpop.f32.mrb[3].mxu1 }
 0x1e9   : > { %v654_v15 = vadd.f32 %v637_v5, %v1393_v59  ;;  %v641_v20 = vadd.f32 %v640_v14, %v572_v63 }
 0x1ea   : > { %v655_v21 = vadd.f32 %v639_v13, %v1391_v58  ;;  %v685_v8 = vmul.f32 %v668_v11, %v653_v12  ;;  %v846_v58 = vpop.permute.xlu1 %845 }
 0x1eb   : > { %v656_v22 = vadd.f32 %v641_v20, %v1395_v60  ;;  %v686_v25 = vmul.f32 %v668_v11, %v654_v15 }
 0x1ec   : > { %v687_v23 = vmul.f32 %v673_v2, %v655_v21 }
 0x1ed   : > { %v688_v26 = vmul.f32 %v673_v2, %v656_v22  ;;  %v644_v27 = vpop.f32.mrb[4].mxu1 }
 0x1ee   : > { %v693_v28 = vadd.f32 %v687_v23, %v685_v8  ;;  %v645_v29 = vadd.f32 %v644_v27, %v577_v62  ;;  %v646_v30 = vpop.f32.mrb[5].mxu1  ;;  %v937_v48 = vpop.permute.xlu1 %936 }
 0x1ef   : > { %v702_v61 = vadd.f32 %v688_v26, %v686_v25  ;;  %v647_v31 = vadd.f32 %v646_v30, %v577_v62  ;;  %v648_v32 = vpop.f32.mrb[6].mxu1 }
 0x1f0   : > { %v657_v59 = vadd.f32 %v645_v29, %v1413_v19  ;;  %v649_v33 = vadd.f32 %v648_v32, %v582_v0  ;;  %v650_v34 = vpop.f32.mrb[7].mxu1 }
 0x1f1   : > { %v658_v35 = vadd.f32 %v647_v31, %v1409_v17  ;;  %v651_v60 = vadd.f32 %v650_v34, %v582_v0 }
 0x1f2   : > { %v689_v36 = vmul.f32 %v678_v24, %v657_v59  ;;  %v659_v37 = vadd.f32 %v649_v33, %v1407_v16  ;;  %v942_v63 = vpop.permute.xlu1 %941  ;;  %v983_v59 = vlaneseq }
 0x1f3   : > { %v690_v39 = vmul.f32 %v678_v24, %v658_v35  ;;  %v660_v40 = vadd.f32 %v651_v60, %v1411_v18 }
 0x1f4   : > { %v694_v41 = vadd.f32 %v693_v28, %v689_v36  ;;  %v691_v42 = vmul.f32 %v683_v38, %v659_v37  ;;  %v984_v37 = vshrl.u32 %v983_v59, 7 }
 0x1f5   : > { %v703_v43 = vadd.f32 %v702_v61, %v690_v39  ;;  %v692_v44 = vmul.f32 %v683_v38, %v660_v40  ;;  %v898_v45 = vpop.f32.mrb[8].mxu1 }
 0x1f6   : > { %v695_v46 = vadd.f32 %v694_v41, %v691_v42  ;;  %v899_v19 = vadd.f32 %v898_v45, %v831_v57  ;;  %v900_v47 = vpop.f32.mrb[9].mxu1  ;;  %v947_v23 = vpop.permute.xlu1 %946 }
 0x1f7   : > { %v704_v49 = vadd.f32 %v703_v43, %v692_v44  ;;  %v901_v50 = vadd.f32 %v900_v47, %v831_v57  ;;  %v902_v17 = vpop.f32.mrb[10].mxu1  ;;  %v985_v44 = vsub.s32 0, %v984_v37 }
 0x1f8   : > { %v917_v51 = vmax.f32 %v899_v19, 0.0  ;;  %v903_v52 = vadd.f32 %v902_v17, %v836_v1  ;;  %v904_v53 = vpop.f32.mrb[11].mxu1  ;;  %v696_v6 = vrot.slane %v695_v46, 4 }
 0x1f9   : > { %v918_v16 = vmax.f32 %v901_v50, 0.0  ;;  %v905_v54 = vadd.f32 %v904_v53, %v836_v1  ;;  %v705_v57 = vrot.slane %v704_v49, 4 }
 0x1fa   : > { %v919_v55 = vmax.f32 %v903_v52, 0.0  ;;  %v949_v18 = vmul.f32 %v932_v9, %v917_v51  ;;  %v697_v22 = vadd.f32 %v696_v6, %v695_v46  ;;  %v981_v46 = vpop.permute.xlu0 %980 }
 0x1fb   : > { %v920_v56 = vmax.f32 %v905_v54, 0.0  ;;  %v950_v0 = vmul.f32 %v932_v9, %v918_v16  ;;  %v706_v24 = vadd.f32 %v705_v57, %v704_v49  ;;  %v986_v17 = vrot.slane %v981_v46, %v985_v44 }
 0x1fc   : > { %v951_v62 = vmul.f32 %v937_v48, %v919_v55  ;;  %v698_v61 = vrot.slane %v697_v22, 2 }
 0x1fd   : > { %v952_v2 = vmul.f32 %v937_v48, %v920_v56  ;;  %v908_v4 = vpop.f32.mrb[12].mxu1 }
 0x1fe   : > { %v957_v7 = vadd.f32 %v951_v62, %v949_v18  ;;  %v909_v5 = vadd.f32 %v908_v4, %v1438_v3  ;;  %v910_v10 = vpop.f32.mrb[13].mxu1  ;;  %v699_v35 = vadd.f32 %v698_v61, %v697_v22 }
 0x1ff   : > { %v966_v12 = vadd.f32 %v952_v2, %v950_v0  ;;  %v911_v13 = vadd.f32 %v910_v10, %v1438_v3  ;;  %v912_v14 = vpop.f32.mrb[14].mxu1  ;;  %v707_v3 = vrot.slane %v706_v24, 2 }
 0x200   : > { %v921_v15 = vmax.f32 %v909_v5, 0.0  ;;  %v913_v1 = vadd.f32 %v912_v14, %v846_v58  ;;  %v914_v20 = vpop.f32.mrb[15].mxu1  ;;  %v700_v40 = vrot.slane %v699_v35, 1 }
 0x201   : > { %v922_v21 = vmax.f32 %v911_v13, 0.0  ;;  %v915_v11 = vadd.f32 %v914_v20, %v846_v58  ;;  %v708_v60 = vadd.f32 %v707_v3, %v706_v24 }
 0x202   : > { %v953_v8 = vmul.f32 %v942_v63, %v921_v15  ;;  %v923_v9 = vmax.f32 %v913_v1, 0.0  ;;  %v701_v47 = vadd.f32 %v700_v40, %v699_v35 }
 0x203   : > { %v954_v25 = vmul.f32 %v942_v63, %v922_v21  ;;  %v924_v26 = vmax.f32 %v915_v11, 0.0  ;;  %v709_v42 = vrot.slane %v708_v60, 1 }
 0x204   : > { %v958_v27 = vadd.f32 %v957_v7, %v953_v8  ;;  %v955_v28 = vmul.f32 %v947_v23, %v923_v9 }
 0x205   : > { %v967_v29 = vadd.f32 %v966_v12, %v954_v25  ;;  %v956_v30 = vmul.f32 %v947_v23, %v924_v26  ;;  %v710_v49 = vadd.f32 %v709_v42, %v708_v60 }
 0x206   : > { %v959_v31 = vadd.f32 %v958_v27, %v955_v28 }
 0x207   : > { %v968_v32 = vadd.f32 %v967_v29, %v956_v30 }
 0x208   : > { %v960_v33 = vrot.slane %v959_v31, 4 }
 0x209   : > { %v969_v34 = vrot.slane %v968_v32, 4 }
 0x20a   : > { %v961_v58 = vadd.f32 %v960_v33, %v959_v31 }
 0x20b   : > { %v970_v36 = vadd.f32 %v969_v34, %v968_v32 }
 0x20c   : > { %v962_v38 = vrot.slane %v961_v58, 2 }
 0x20d   : > { %v971_v39 = vrot.slane %v970_v36, 2 }
 0x20e   : > { %v963_v41 = vadd.f32 %v962_v38, %v961_v58 }
 0x20f   : > { %v972_v43 = vadd.f32 %v971_v39, %v970_v36 }
 0x210   : > { %v964_v45 = vrot.slane %v963_v41, 1 }
 0x211   : > { %v973_v19 = vrot.slane %v972_v43, 1 }
 0x212   : > { %v965_v48 = vadd.f32 %v964_v45, %v963_v41 }
 0x213   : > { %v974_v50 = vadd.f32 %v973_v19, %v972_v43 }
 0x214   : > { %v975_v51 = vadd.f32 %v965_v48, %v701_v47 }
 0x215   : > { %v976_v52 = vadd.f32 %v974_v50, %v710_v49 }
 0x216   : > { %v987_v53 = vadd.f32 %v986_v17, %v975_v51 }
 0x217   : > { %v988_v16 = vadd.f32 %v986_v17, %v976_v52 }
 0x218   : > { %v1104_v54 = vmul.f32 -1.442695, %v987_v53 }
 0x219   : > { %v1105_v55 = vmul.f32 -1.442695, %v988_v16 }
 0x21a   : > { %1148 = vpow2.f32 %v1104_v54 }
 0x21b   : > { %1150 = vpow2.f32 %v1105_v55 }
 0x224   : > { %v1149_v56 = vpop.eup %1148 }
 0x225   : > { %v1151_v18 = vpop.eup %1150  ;;  %v995_v62 = vadd.f32 1.0, %v1149_v56 }
 0x226   : > { %v996_v63 = vadd.f32 1.0, %v1151_v18 }
 0x227   : > { %1152 = vrcp.f32 %v995_v62 }
 0x228   : > { %1154 = vrcp.f32 %v996_v63 }
 0x231   : > { %v1153_v0 = vpop.eup %1152 }
 0x232   : > { %v1155_v2 = vpop.eup %1154  ;;  %1001 = vst [vmem:[%s409_s19] sm:$0xff] %v1153_v0 }
 0x233   : > { %1002 = vst [vmem:[%s409_s19 + $0x8] sm:$0xff] %v1155_v2 }
 0x234 PF: > { %p19_p9 = scmp.ge.s32.totalorder %s1256_s18, 4   ;;  %s1476_s15 = smov %s1174_s16 }
 0x235   : > { %s1477_s16 = smov %s1265_s21  ;;  %s1478_s17 = smov %s1256_s18 }
 0x236   :  { %21 = sbr.rel (!%p19_p9) target bundleno = 5 (0x5), region = 135 }

</bundles_post_ra>
